<compile_context>
chip_gen: v5e
topology: v5e:2x2
jax: 0.10.0
libtpu: 0.0.40
codegen_flags: <defaults>
</compile_context>

<pallas_src>
import functools

import jax
import jax.numpy as jnp
from jax.experimental import pallas as pl
from jax.experimental.pallas import tpu as pltpu


def _round_up(a: int, b: int) -> int:
    return (a + b - 1) // b * b


@functools.lru_cache(maxsize=1)
def _vmem_limit_bytes() -> int:
    # Explicit VMEM budget: capacity minus 16 MiB headroom, capped at 112 MiB.
    # Resolves to ~48 MiB on v7x (64 MiB physical) and 112 MiB on v5e/v6e.
    try:
        cap = pltpu.get_tpu_info().vmem_capacity_bytes
    except Exception:
        cap = 64 * 1024 * 1024
    return int(min(cap - 16 * 1024 * 1024, 112 * 1024 * 1024))


def _choose_groups_per_ktile(num_groups: int, groupsize: int,
                             tk_target: int) -> int:
    """Largest groups-per-K-tile with tk <= tk_target (lane-legal tk).

    If no divisor of num_groups yields tk <= tk_target, return the *smallest*
    legal one instead of the whole K axis, so a single K-block can never blow
    past the VMEM budget (v7x guard from the perf review).
    """
    smallest_legal = num_groups
    for cand in range(num_groups, 0, -1):
        if num_groups % cand != 0:
            continue
        tk = cand * groupsize
        # activation block last dim must be a multiple of 128 (or the full K)
        if tk % 128 != 0 and cand != num_groups:
            continue
        if tk <= tk_target:
            return cand
        smallest_legal = cand
    return smallest_legal


# ---------------------------------------------------------------------------
# Load-time prepack: transpose weights to (K, N) and scales/zeros to (G, N)
# (lane-dense), pad N, cast scales/zeros to bf16.  Done ONCE per layer.
# ---------------------------------------------------------------------------
def prepack_int8da_int4w(weight_int8, scales, zeros, groupsize):
    N, K = weight_int8.shape
    assert K % groupsize == 0, "in_features must be divisible by groupsize"
    assert groupsize % 8 == 0, "groupsize must be a multiple of 8"
    num_groups = K // groupsize

    # Prefer the full 256-wide MXU (v6e/v7x); fall back to 128 only for tiny N.
    # TODO(synk): on v5e (128-wide MXU) tn=128 with a 128-pad fetches fewer
    # padded weight bytes for awkward N.
    tn = 256 if N >= 192 else 128
    n_pad = _round_up(N, tn)

    w_t = jnp.asarray(weight_int8, jnp.int8).T                       # (K, N)
    s_t = jnp.asarray(scales, jnp.float32).T.astype(jnp.bfloat16)    # (G, N)
    z_t = jnp.asarray(zeros, jnp.float32).T.astype(jnp.bfloat16)     # (G, N)
    if n_pad != N:
        w_t = jnp.pad(w_t, ((0, 0), (0, n_pad - N)))
        s_t = jnp.pad(s_t, ((0, 0), (0, n_pad - N)))
        z_t = jnp.pad(z_t, ((0, 0), (0, n_pad - N)))
    # TODO(synk): pack two int4 values per byte here and unpack in-kernel with
    # shift/mask to halve decode-time weight HBM traffic.
    return dict(w_t=w_t, s_t=s_t, z_t=z_t, N=N, K=K, groupsize=groupsize,
                num_groups=num_groups, tn=tn, n_pad=n_pad)


# ---------------------------------------------------------------------------
# Pass 1: per-token dynamic int8 quant -> dequant of the activation (hoisted
# out of the matmul so the reduce/round work runs once per token, not per
# N/K tile).  Emits bf16.
# ---------------------------------------------------------------------------
def _act_quant_kernel(x_ref, o_ref):
    x = x_ref[...].astype(jnp.float32)                      # (tm, K)
    qmin, qmax = -128.0, 127.0
    min_neg = jnp.minimum(jnp.min(x, axis=-1, keepdims=True), 0.0)
    max_pos = jnp.maximum(jnp.max(x, axis=-1, keepdims=True), 0.0)
    eps = jnp.finfo(jnp.float32).eps
    scale = jnp.maximum((max_pos - min_neg) / (qmax - qmin), eps)
    # One reciprocal per row; the per-element divide over (tm, K) becomes a
    # multiply.  (Exact 1/x rather than approx to stay bit-close to the
    # torch reference's x/scale.)
    inv_scale = 1.0 / scale
    descaled_min = min_neg * inv_scale
    descaled_max = max_pos * inv_scale
    zp = jnp.where(
        (qmin + descaled_min) + (qmax + descaled_max) > 0.0,
        qmin - descaled_min,
        qmax - descaled_max,
    )
    zp = jnp.round(jnp.clip(zp, qmin, qmax))
    x_q = jnp.clip(jnp.round(x * inv_scale) + zp, qmin, qmax)
    # TODO(synk): keep x_q as int8 plus per-token (scale, zp) and drive the
    # MXU with int8 x int4 (rank-1 zero-point correction epilogue) on v5e/v6e.
    o_ref[...] = ((x_q - zp) * scale).astype(o_ref.dtype)


# ---------------------------------------------------------------------------
# Pass 2: K-blocked group-wise weight dequant (int4-in-int8 -> bf16) + matmul
# with a float32 VMEM accumulator.
# ---------------------------------------------------------------------------
def _matmul_kernel(x_ref, w_ref, s_ref, z_ref, o_ref, acc_ref, *, groupsize):
    k = pl.program_id(2)

    @pl.when(k == 0)
    def _init():
        acc_ref[...] = jnp.zeros_like(acc_ref)

    # int8 -> bf16 is exact for the int4 range; keep the whole dequant chain
    # in bf16 (halves VALU ops + intermediate VMEM vs f32 on v6e/v7x).
    # TODO(synk): on v5e keep the dequant arithmetic in f32 (no bf16 VALU).
    w = w_ref[...].astype(jnp.bfloat16)                      # (tk, tn)
    tk, tn = w.shape
    g = tk // groupsize
    w3 = w.reshape(g, groupsize, tn)                         # sublane-only split
    s = s_ref[0][:, None, :]                                 # (g, 1, tn) bf16
    z = z_ref[0][:, None, :]                                 # (g, 1, tn) bf16
    w_dq = ((w3 - z) * s).reshape(tk, tn)                    # bf16

    acc_ref[...] += jnp.dot(x_ref[...], w_dq,
                            preferred_element_type=jnp.float32)

    @pl.when(k == pl.num_programs(2) - 1)
    def _store():
        o_ref[...] = acc_ref[...].astype(o_ref.dtype)


def int8da_int4w_linear(x, packed, *, tm=256, tk_target=1024):
    """JAX/Pallas equivalent of Int8DynActInt4WeightLinear.forward.

    `packed` is the dict returned by `prepack_int8da_int4w` (built once per
    layer at load time; no per-call weight transpose/pad).
    """
    K, N = packed["K"], packed["N"]
    n_pad, tn = packed["n_pad"], packed["tn"]
    groupsize, num_groups = packed["groupsize"], packed["num_groups"]

    orig_shape = x.shape
    assert orig_shape[-1] == K
    x2 = x.reshape(-1, K)                       # native dtype; cast in-kernel
    M = x2.shape[0]

    # ---- tile sizes (MXU-sized; pad ragged M instead of shrinking tiles) ---
    tm = max(8, min(tm, _round_up(M, 16)))
    tm = _round_up(tm, 8)
    m_pad = _round_up(M, tm)
    if m_pad != M:
        x2 = jnp.pad(x2, ((0, m_pad - M), (0, 0)))

    gpt = _choose_groups_per_ktile(num_groups, groupsize, tk_target)
    tk = gpt * groupsize
    nk = num_groups // gpt

    # Tiny, contiguous reshape so the per-K-tile scale/zero block covers the
    # full group axis (legal for any gpt).
    s3 = packed["s_t"].reshape(nk, gpt, n_pad)
    z3 = packed["z_t"].reshape(nk, gpt, n_pad)

    vmem_limit = _vmem_limit_bytes()

    # ---- pass 1: hoisted per-token dynamic activation quant ----------------
    x_dq = pl.pallas_call(
        _act_quant_kernel,
        out_shape=jax.ShapeDtypeStruct((m_pad, K), jnp.bfloat16),
        grid_spec=pltpu.PrefetchScalarGridSpec(
            num_scalar_prefetch=0,
            grid=(m_pad // tm,),
            in_specs=[pl.BlockSpec((tm, K), lambda i: (i, 0))],
            out_specs=pl.BlockSpec((tm, K), lambda i: (i, 0)),
        ),
        compiler_params=pltpu.CompilerParams(
            dimension_semantics=("parallel",),
            vmem_limit_bytes=vmem_limit),
    )(x2)

    # ---- pass 2: K-blocked dequant-matmul with f32 accumulator -------------
    kernel = functools.partial(_matmul_kernel, groupsize=groupsize)
    out = pl.pallas_call(
        kernel,
        out_shape=jax.ShapeDtypeStruct((m_pad, n_pad), x.dtype),
        grid_spec=pltpu.PrefetchScalarGridSpec(
            num_scalar_prefetch=0,
            grid=(m_pad // tm, n_pad // tn, nk),
            in_specs=[
                pl.BlockSpec((tm, tk), lambda i, j, k: (i, k)),    # bf16 acts
                pl.BlockSpec((tk, tn), lambda i, j, k: (k, j)),    # int8 weights
                pl.BlockSpec((1, gpt, tn), lambda i, j, k: (k, 0, j)),  # scales
                pl.BlockSpec((1, gpt, tn), lambda i, j, k: (k, 0, j)),  # zeros
            ],
            out_specs=pl.BlockSpec((tm, tn), lambda i, j, k: (i, j)),
            scratch_shapes=[pltpu.VMEM((tm, tn), jnp.float32)],
        ),
        compiler_params=pltpu.CompilerParams(
            dimension_semantics=("parallel", "parallel", "arbitrary"),
            vmem_limit_bytes=vmem_limit),
    )(x_dq, packed["w_t"], s3, z3)

    out = out[:M, :N]
    return out.reshape(*orig_shape[:-1], N)


def _reference(x, weight_int8, scales, zeros, groupsize):
    """Pure-JAX reference mirroring linear_forward_8da4w semantics (f32)."""
    N, K = weight_int8.shape
    x2 = x.reshape(-1, K).astype(jnp.float32)
    qmin, qmax = -128.0, 127.0
    min_neg = jnp.minimum(jnp.min(x2, axis=-1, keepdims=True), 0.0)
    max_pos = jnp.maximum(jnp.max(x2, axis=-1, keepdims=True), 0.0)
    scale = jnp.maximum((max_pos - min_neg) / (qmax - qmin),
                        jnp.finfo(jnp.float32).eps)
    zp = jnp.where((qmin + min_neg / scale) + (qmax + max_pos / scale) > 0.0,
                   qmin - min_neg / scale, qmax - max_pos / scale)
    zp = jnp.round(jnp.clip(zp, qmin, qmax))
    x_dq = (jnp.clip(jnp.round(x2 / scale) + zp, qmin, qmax) - zp) * scale
    w3 = weight_int8.astype(jnp.float32).reshape(N, K // groupsize, groupsize)
    w_dq = ((w3 - zeros[:, :, None]) * scales[:, :, None]).reshape(N, K)
    out = x_dq @ w_dq.T
    return out.reshape(*x.shape[:-1], N)


if __name__ == "__main__":
    def make_case(key, B, T, K, N, groupsize):
        k1, k2, k3, k4 = jax.random.split(key, 4)
        x = jax.random.normal(k1, (B, T, K), dtype=jnp.float32)
        # int4 values stored in an int8 buffer, as in the PyTorch module
        w = jax.random.randint(k2, (N, K), -8, 8,
                               dtype=jnp.int32).astype(jnp.int8)
        s = jax.random.uniform(k3, (N, K // groupsize), minval=0.01,
                               maxval=0.1, dtype=jnp.float32)
        z = jax.random.randint(k4, (N, K // groupsize), -2, 3,
                               dtype=jnp.int32).astype(jnp.float32)
        return x, w, s, z

    key = jax.random.PRNGKey(0)
    keys = jax.random.split(key, 3)

    # (B, T, K, N, groupsize, forward kwargs):
    #   1) plain single-tile path
    #   2) multi-K accumulation + padded M + padded N
    #   3) multiple M tiles (small tm override)
    cases = [
        (2, 8, 256, 256, 128, dict()),
        (1, 20, 512, 192, 64, dict(tk_target=256)),
        (2, 24, 256, 256, 128, dict(tm=16)),
    ]

    for (B, T, K, N, g, kw), ck in zip(cases, keys):
        x, w, s, z = make_case(ck, B, T, K, N, g)
        packed = prepack_int8da_int4w(w, s, z, g)      # once, at load time
        out = int8da_int4w_linear(x, packed, **kw)
        out = jax.block_until_ready(out)

        ref = _reference(x, w, s, z, g)
        assert out.shape == ref.shape == (B, T, N)

        # The MXU runs on bf16-dequantized operands (with f32 accumulation);
        # the reference is pure f32, so allow a small absolute slack plus a
        # tight relative-RMS check.  (Intentional deviation; documented.)
        rel_rms = jnp.sqrt(jnp.mean((out - ref) ** 2)) / (
            jnp.sqrt(jnp.mean(ref ** 2)) + 1e-12)
        assert jnp.allclose(out, ref, rtol=2e-2, atol=1e-1), (
            (B, T, K, N, g), float(jnp.max(jnp.abs(out - ref))))
        assert rel_rms < 1e-2, ((B, T, K, N, g), float(rel_rms))

    print("KERNEL_OK")
</pallas_src>

<mosaic_0001>
module attributes {stable_mosaic.version = 11 : i64} {
  func.func @_act_quant_kernel(%arg0: i32, %arg1: memref<16x256xf32, #tpu.memory_space<vmem>>, %arg2: memref<16x256xbf16, #tpu.memory_space<vmem>>) attributes {dimension_semantics = [#tpu.dimension_semantics<parallel>], iteration_bounds = array<i64: 1>, scalar_prefetch = 0 : i64, scratch_operands = 0 : i64, tpu.core_type = #tpu.core_type<tc>, window_params = [{transform_indices = @transform_0, window_bounds = array<i64: 16, 256>}, {transform_indices = @transform_1, window_bounds = array<i64: 16, 256>}]} {
    %c0 = arith.constant 0 : index
    %c0_0 = arith.constant 0 : index
    %0 = vector.load %arg1[%c0, %c0_0] : memref<16x256xf32, #tpu.memory_space<vmem>>, vector<16x256xf32>
    %cst = arith.constant dense<0x7F800000> : vector<16xf32>
    %1 = vector.multi_reduction <minimumf>, %0, %cst [1] : vector<16x256xf32> to vector<16xf32>
    %2 = vector.shape_cast %1 : vector<16xf32> to vector<16x1xf32>
    %cst_1 = arith.constant 0.000000e+00 : f32
    %3 = vector.broadcast %cst_1 : f32 to vector<16x1xf32>
    %4 = arith.minimumf %2, %3 : vector<16x1xf32>
    %cst_2 = arith.constant dense<0xFF800000> : vector<16xf32>
    %5 = vector.multi_reduction <maximumf>, %0, %cst_2 [1] : vector<16x256xf32> to vector<16xf32>
    %6 = vector.shape_cast %5 : vector<16xf32> to vector<16x1xf32>
    %cst_3 = arith.constant 0.000000e+00 : f32
    %7 = vector.broadcast %cst_3 : f32 to vector<16x1xf32>
    %8 = arith.maximumf %6, %7 : vector<16x1xf32>
    %9 = arith.subf %8, %4 : vector<16x1xf32>
    %cst_4 = arith.constant 2.550000e+02 : f32
    %10 = vector.broadcast %cst_4 : f32 to vector<16x1xf32>
    %11 = arith.divf %9, %10 : vector<16x1xf32>
    %cst_5 = arith.constant 1.1920929E-7 : f32
    %12 = vector.broadcast %cst_5 : f32 to vector<16x1xf32>
    %13 = arith.maximumf %11, %12 : vector<16x1xf32>
    %cst_6 = arith.constant 1.000000e+00 : f32
    %14 = vector.broadcast %cst_6 : f32 to vector<16x1xf32>
    %15 = arith.divf %14, %13 : vector<16x1xf32>
    %16 = arith.mulf %4, %15 : vector<16x1xf32>
    %17 = arith.mulf %8, %15 : vector<16x1xf32>
    %cst_7 = arith.constant -1.280000e+02 : f32
    %18 = vector.broadcast %cst_7 : f32 to vector<16x1xf32>
    %19 = arith.addf %18, %16 : vector<16x1xf32>
    %cst_8 = arith.constant 1.270000e+02 : f32
    %20 = vector.broadcast %cst_8 : f32 to vector<16x1xf32>
    %21 = arith.addf %20, %17 : vector<16x1xf32>
    %22 = arith.addf %19, %21 : vector<16x1xf32>
    %cst_9 = arith.constant 0.000000e+00 : f32
    %23 = vector.broadcast %cst_9 : f32 to vector<16x1xf32>
    %24 = arith.cmpf ogt, %22, %23 : vector<16x1xf32>
    %cst_10 = arith.constant -1.280000e+02 : f32
    %25 = vector.broadcast %cst_10 : f32 to vector<16x1xf32>
    %26 = arith.subf %25, %16 : vector<16x1xf32>
    %cst_11 = arith.constant 1.270000e+02 : f32
    %27 = vector.broadcast %cst_11 : f32 to vector<16x1xf32>
    %28 = arith.subf %27, %17 : vector<16x1xf32>
    %29 = arith.select %24, %26, %28 : vector<16x1xi1>, vector<16x1xf32>
    %cst_12 = arith.constant -1.280000e+02 : f32
    %cst_13 = arith.constant 1.270000e+02 : f32
    %30 = vector.broadcast %cst_12 : f32 to vector<16x1xf32>
    %31 = arith.maximumf %30, %29 : vector<16x1xf32>
    %32 = vector.broadcast %cst_13 : f32 to vector<16x1xf32>
    %33 = arith.minimumf %32, %31 : vector<16x1xf32>
    %34 = math.roundeven %33 : vector<16x1xf32>
    %35 = vector.broadcast %15 : vector<16x1xf32> to vector<16x256xf32>
    %36 = arith.mulf %0, %35 : vector<16x256xf32>
    %37 = math.roundeven %36 : vector<16x256xf32>
    %38 = vector.broadcast %34 : vector<16x1xf32> to vector<16x256xf32>
    %39 = arith.addf %37, %38 : vector<16x256xf32>
    %cst_14 = arith.constant -1.280000e+02 : f32
    %cst_15 = arith.constant 1.270000e+02 : f32
    %40 = vector.broadcast %cst_14 : f32 to vector<16x256xf32>
    %41 = arith.maximumf %40, %39 : vector<16x256xf32>
    %42 = vector.broadcast %cst_15 : f32 to vector<16x256xf32>
    %43 = arith.minimumf %42, %41 : vector<16x256xf32>
    %44 = vector.broadcast %34 : vector<16x1xf32> to vector<16x256xf32>
    %45 = arith.subf %43, %44 : vector<16x256xf32>
    %46 = vector.broadcast %13 : vector<16x1xf32> to vector<16x256xf32>
    %47 = arith.mulf %45, %46 : vector<16x256xf32>
    %48 = arith.truncf %47 : vector<16x256xf32> to vector<16x256xbf16>
    %c0_16 = arith.constant 0 : index
    %c0_17 = arith.constant 0 : index
    %49 = vector.load %arg2[%c0_16, %c0_17] : memref<16x256xbf16, #tpu.memory_space<vmem>>, vector<16x256xbf16>
    tpu.vector_store %arg2[%c0_16, %c0_17], %48 {strides = array<i32>} : memref<16x256xbf16, #tpu.memory_space<vmem>>, vector<16x256xbf16>,
    return
  }
  func.func @transform_0(%arg0: i32) -> (i32, i32) {
    %c0_i32 = arith.constant 0 : i32
    %c0_i32_0 = arith.constant 0 : i32
    return %arg0, %c0_i32 : i32, i32
  }
  func.func @transform_1(%arg0: i32) -> (i32, i32) {
    %c0_i32 = arith.constant 0 : i32
    %c0_i32_0 = arith.constant 0 : i32
    return %arg0, %c0_i32 : i32, i32
  }
}

</mosaic_0001>

<bundles_post_ra>
// kernel: tpu_custom_call.1
= control target key start
LH: loop header
LB: loop body
LE: loop exit
PB: predicated region body
PF: predicated region fallthrough
CT: control target
= control target key end

     0   :  { %6 = vsyncpa [#allocation3], 0  ;;  %s351_s0 = inlined_call_operand.hbm [shape: f32[16,256], index: 0, kind: input, shape index: {}]   ;;  %s352_s1 = inlined_call_operand.hbm [shape: bf16[16,256], index: 1, kind: output, shape index: {}]  }
   0x1   :  { %7 = vsyncpa [#allocation4], 0  ;;  %s12_s8 = sshll.u32 %s351_s0, 4  ;;  %s276_s9 = smov [#allocation2]   ;;  %s13_s8 = int_to_ptr.hbm [resolvable:$true] %s12_s8 }
   0x2   :  { %s14_s10 = sshll.u32 %s276_s9, 4  ;;  %s277_s11 = smov 256   ;;  %s15_s10 = int_to_ptr.vmem [resolvable:$true] %s14_s10 }
   0x3   :  { %s278_s12 = smov 16  }
   0x4   :  { %20 = dma.hbm_to_vmem [thread:$0]  %s13_s8, 512, %s15_s10, [#allocation3], %s277_s11, %s277_s11, %s278_s12  }
   0x5   :  { %272 = dma.done.wait [#allocation3], 512  }
   0x6   :  { %273 = vsyncadd [#allocation3], 4294966784  ;;  %v25_v0 = vld [vmem:[#allocation2] sm:$0xff]  ;;  %v26_v1 = vld [vmem:[#allocation2 + $0x8] sm:$0xff]  ;;  %v279_v8 = vmov 255.0   ;;  %s280_s0 = smov [#allocation5]  }
   0x7   :  { %v37_v2 = vmax.f32 %v25_v0, %v26_v1  ;;  %v29_v3 = vmin.f32 %v25_v0, %v26_v1  ;;  %v296_v4 = vld [vmem:[#allocation2 + $0x10] sm:$0xff]  ;;  %v298_v5 = vld [vmem:[#allocation2 + $0x18] sm:$0xff]  ;;  %218 = vrcp.f32 %v279_v8  ;;  %s148_s13 = sshll.u32 %s280_s0, 4  ;;  %s150_s16 = sshll.u32 %s352_s1, 4  ;;  %s149_s13 = int_to_ptr.vmem [resolvable:$true] %s148_s13  ;;  %s151_s16 = int_to_ptr.hbm [resolvable:$true] %s150_s16 }
   0x8   :  { %v40_v6 = vmax.f32 %v296_v4, %v298_v5  ;;  %v32_v7 = vmin.f32 %v296_v4, %v298_v5  ;;  %s281_s17 = smov 128   ;;  %s282_s18 = smov 8  }
   0x9   :  { %38 = vmax.xlane.f32.xlu1 %v37_v2  ;;  %30 = vmin.xlane.f32.xlu0 %v29_v3 }
   0xd   :  { %v219_v9 = vpop.eup %218 }
   0xe   :  { %v48_v10 = vmul.f32 255.0, %v219_v9  ;;  %vm52_vm0 = vweird.f32 %v219_v9 }
  0x10   :  { %v49_v11 = vsub.f32 1.0, %v48_v10 }
  0x11   :  { %41 = vmax.xlane.f32.xlu1 %v40_v6  ;;  %33 = vmin.xlane.f32.xlu0 %v32_v7 }
  0x12   :  { %v50_v12 = vmul.f32 %v219_v9, %v49_v11 }
  0x14   :  { %v51_v13 = vadd.f32 %v219_v9, %v50_v12 }
  0x16   :  { %v53_v18 = vsel %vm52_vm0, %v219_v9, %v51_v13 }
  0x7c   :  { %v39_v14 = vpop.xlane.xlu1 %38  ;;  %v31_v15 = vpop.xlane.xlu0 %30 }
  0x7d   :  { %v43_v16 = vmax.f32 %v39_v14, 0.0  ;;  %v35_v17 = vmin.f32 %v31_v15, 0.0 }
  0x7f   :  { %v45_v19 = vsub.f32 %v43_v16, %v35_v17 }
  0x81   :  { %v54_v20 = vmul.f32 %v53_v18, %v45_v19 }
  0x83   :  { %v304_v21 = vmax.f32 %v54_v20, 1.1920929e-07 }
  0x84   :  { %v42_v22 = vpop.xlane.xlu1 %41  ;;  %v34_v23 = vpop.xlane.xlu0 %33 }
  0x85   :  { %220 = vrcp.f32 %v304_v21  ;;  %v44_v24 = vmax.f32 %v42_v22, 0.0  ;;  %v36_v25 = vmin.f32 %v34_v23, 0.0  ;;  %v69_v32 = vand.u32 2147483648, %v304_v21 }
  0x86   :  { %v67_v34 = vand.u32 2147483647, %v304_v21  ;;  %vm63_vm2 = vweird.f32 %v304_v21 }
  0x87   :  { %v46_v26 = vsub.f32 %v44_v24, %v36_v25  ;;  %v70_v36 = vor.u32 1.1754944e-38, %v69_v32 }
  0x88   :  { %vm68_vm4 = vcmp.eq.f32.partialorder %v67_v34, 8.507059e+37 }
  0x89   :  { %v55_v27 = vmul.f32 %v53_v18, %v46_v26 }
  0x8b   :  { %v221_v28 = vpop.eup %220  ;;  %v308_v30 = vmax.f32 %v55_v27, 1.1920929e-07 }
  0x8c   :  { %v59_v29 = vmul.f32 %v221_v28, %v304_v21  ;;  %vm64_vm1 = vweird.f32 %v221_v28 }
  0x8d   :  { %222 = vrcp.f32 %v308_v30  ;;  %vm65_vm3 = vmor %vm63_vm2, %vm64_vm1  ;;  %v82_v49 = vand.u32 2147483647, %v308_v30  ;;  %v84_v50 = vand.u32 2147483648, %v308_v30  ;;  %vm78_vm7 = vweird.f32 %v308_v30 }
  0x8e   :  { %v60_v31 = vsub.f32 1.0, %v59_v29 }
  0x8f   :  { %v85_v60 = vor.u32 1.1754944e-38, %v84_v50  ;;  %vm83_vm9 = vcmp.eq.f32.partialorder %v82_v49, 8.507059e+37 }
  0x90   :  { %v61_v33 = vmul.f32 %v221_v28, %v60_v31 }
  0x92   :  { %v62_v35 = vadd.f32 %v221_v28, %v61_v33 }
  0x93   :  { %v223_v37 = vpop.eup %222 }
  0x94   :  { %v66_v38 = vsel %vm65_vm3, %v221_v28, %v62_v35  ;;  %v74_v40 = vmul.f32 %v223_v37, %v308_v30  ;;  %vm79_vm5 = vweird.f32 %v223_v37 }
  0x95   :  { %v71_v39 = vsel %vm68_vm4, %v70_v36, %v66_v38  ;;  %vm80_vm8 = vmor %vm78_vm7, %vm79_vm5 }
  0x96   :  { %v88_v41 = vmul.f32 %v71_v39, %v35_v17  ;;  %v90_v42 = vmul.f32 %v71_v39, %v43_v16  ;;  %v315_v43 = vmul.f32 %v71_v39, %v25_v0  ;;  %v317_v44 = vmul.f32 %v71_v39, %v26_v1 }
  0x97   :  { %v75_v45 = vsub.f32 1.0, %v74_v40 }
  0x98   :  { %v92_v46 = vadd.f32 -128.0, %v88_v41  ;;  %v94_v47 = vadd.f32 127.0, %v90_v42  ;;  %v181_v48 = vcvt.f32.s32 %v315_v43  ;;  %v189_v52 = vcvt.f32.s32 %v317_v44 }
  0x99   :  { %v76_v53 = vmul.f32 %v223_v37, %v75_v45  ;;  %v100_v54 = vsub.f32 -128.0, %v88_v41  ;;  %v102_v55 = vsub.f32 127.0, %v90_v42  ;;  %v184_v10 = vand.u32 2147483648, %v315_v43 }
  0x9a   :  { %v96_v51 = vadd.f32 %v94_v47, %v92_v46  ;;  %v182_v56 = vcvt.s32.f32 %v181_v48  ;;  %v190_v59 = vcvt.s32.f32 %v189_v52  ;;  %v179_v11 = vand.u32 2147483647, %v315_v43 }
  0x9b   :  { %v77_v57 = vadd.f32 %v223_v37, %v76_v53  ;;  %v192_v12 = vand.u32 2147483648, %v317_v44  ;;  %v187_v17 = vand.u32 2147483647, %v317_v44 }
  0x9c   :  { %vm98_vm6 = vcmp.gt.f32.partialorder %v96_v51, 0.0  ;;  %v183_v1 = vand.u32 2147483647, %v182_v56  ;;  %v191_v6 = vand.u32 2147483647, %v190_v59  ;;  %vm180_vm12 = vcmp.lt.f32.partialorder %v179_v11, 8388608.0 }
  0x9d   :  { %v104_v58 = vsel %vm98_vm6, %v100_v54, %v102_v55  ;;  %v81_v62 = vsel %vm80_vm8, %v223_v37, %v77_v57  ;;  %vm188_vm13 = vcmp.lt.f32.partialorder %v187_v17, 8388608.0 }
  0x9e   :  { %v106_v61 = vmax.f32 %v104_v58, -128.0  ;;  %v86_v63 = vsel %vm83_vm9, %v85_v60, %v81_v62  ;;  %v185_v16 = vor.u32 %v184_v10, %v183_v1  ;;  %v193_v19 = vor.u32 %v192_v12, %v191_v6 }
  0x9f   :  { %v89_v2 = vmul.f32 %v86_v63, %v36_v25  ;;  %v91_v3 = vmul.f32 %v86_v63, %v44_v24  ;;  %v325_v7 = vmul.f32 %v86_v63, %v296_v4  ;;  %v328_v8 = vmul.f32 %v86_v63, %v298_v5 }
  0xa0   :  { %v108_v0 = vmin.f32 %v106_v61, 127.0  ;;  %v186_v33 = vsel %vm180_vm12, %v185_v16, %v315_v43  ;;  %v194_v34 = vsel %vm188_vm13, %v193_v19, %v317_v44 }
  0xa1   :  { %v93_v13 = vadd.f32 -128.0, %v89_v2  ;;  %v95_v14 = vadd.f32 127.0, %v91_v3  ;;  %v197_v18 = vcvt.f32.s32 %v325_v7  ;;  %v205_v5 = vcvt.f32.s32 %v328_v8 }
  0xa2   :  { %v165_v9 = vcvt.f32.s32 %v108_v0  ;;  %v163_v4 = vand.u32 2147483647, %v108_v0  ;;  %v168_v23 = vand.u32 2147483648, %v108_v0  ;;  %v101_v24 = vsub.f32 -128.0, %v89_v2 }
  0xa3   :  { %v97_v20 = vadd.f32 %v95_v14, %v93_v13  ;;  %v103_v25 = vsub.f32 127.0, %v91_v3  ;;  %v198_v28 = vcvt.s32.f32 %v197_v18  ;;  %v206_v29 = vcvt.s32.f32 %v205_v5 }
  0xa4   :  { %v166_v15 = vcvt.s32.f32 %v165_v9  ;;  %vm164_vm11 = vcmp.lt.f32.partialorder %v163_v4, 8388608.0  ;;  %v200_v45 = vand.u32 2147483648, %v325_v7  ;;  %v208_v46 = vand.u32 2147483648, %v328_v8 }
  0xa5   :  { %vm99_vm10 = vcmp.gt.f32.partialorder %v97_v20, 0.0  ;;  %v199_v38 = vand.u32 2147483647, %v198_v28  ;;  %v207_v39 = vand.u32 2147483647, %v206_v29 }
  0xa6   :  { %v167_v22 = vand.u32 2147483647, %v166_v15  ;;  %v105_v27 = vsel %vm99_vm10, %v101_v24, %v103_v25  ;;  %v195_v48 = vand.u32 2147483647, %v325_v7  ;;  %v203_v44 = vand.u32 2147483647, %v328_v8 }
  0xa7   :  { %v107_v31 = vmax.f32 %v105_v27, -128.0  ;;  %v201_v51 = vor.u32 %v200_v45, %v199_v38  ;;  %v209_v52 = vor.u32 %v208_v46, %v207_v39 }
  0xa8   :  { %v169_v26 = vor.u32 %v168_v23, %v167_v22  ;;  %vm196_vm15 = vcmp.lt.f32.partialorder %v195_v48, 8388608.0  ;;  %vm204_vm0 = vcmp.lt.f32.partialorder %v203_v44, 8388608.0 }
  0xa9   :  { %v109_v37 = vmin.f32 %v107_v31, 127.0  ;;  %v202_v61 = vsel %vm196_vm15, %v201_v51, %v325_v7  ;;  %v210_v62 = vsel %vm204_vm0, %v209_v52, %v328_v8 }
  0xaa   :  { %v170_v32 = vsel %vm164_vm11, %v169_v26, %v108_v0 }
  0xab   :  { %v120_v35 = vadd.f32 %v186_v33, %v170_v32  ;;  %v121_v36 = vadd.f32 %v194_v34, %v170_v32  ;;  %v173_v42 = vcvt.f32.s32 %v109_v37  ;;  %v171_v43 = vand.u32 2147483647, %v109_v37 }
  0xac   :  { %v176_v54 = vand.u32 2147483648, %v109_v37 }
  0xad   :  { %v124_v40 = vmax.f32 %v120_v35, -128.0  ;;  %v125_v41 = vmax.f32 %v121_v36, -128.0  ;;  %v174_v47 = vcvt.s32.f32 %v173_v42  ;;  %vm172_vm14 = vcmp.lt.f32.partialorder %v171_v43, 8388608.0 }
  0xaf   :  { %v128_v49 = vmin.f32 %v124_v40, 127.0  ;;  %v129_v50 = vmin.f32 %v125_v41, 127.0  ;;  %v175_v53 = vand.u32 2147483647, %v174_v47 }
  0xb1   :  { %v132_v55 = vsub.f32 %v128_v49, %v170_v32  ;;  %v133_v56 = vsub.f32 %v129_v50, %v170_v32  ;;  %v177_v57 = vor.u32 %v176_v54, %v175_v53 }
  0xb3   :  { %v136_v58 = vmul.f32 %v132_v55, %v304_v21  ;;  %v137_v59 = vmul.f32 %v133_v56, %v304_v21  ;;  %v178_v60 = vsel %vm172_vm14, %v177_v57, %v109_v37 }
  0xb4   :  { %v122_v0 = vadd.f32 %v202_v61, %v178_v60  ;;  %v123_v1 = vadd.f32 %v210_v62, %v178_v60 }
  0xb5   :  { %v140_v63 = vpack.c.bf16 %v137_v59, %v136_v58 }
  0xb6   :  { %v126_v2 = vmax.f32 %v122_v0, -128.0  ;;  %v127_v3 = vmax.f32 %v123_v1, -128.0 }
  0xb7   :  { %142 = vst [vmem:[#allocation5] sm:$0xff] %v140_v63 }
  0xb8   :  { %v130_v6 = vmin.f32 %v126_v2, 127.0  ;;  %v131_v9 = vmin.f32 %v127_v3, 127.0 }
  0xba   :  { %v134_v10 = vsub.f32 %v130_v6, %v178_v60  ;;  %v135_v11 = vsub.f32 %v131_v9, %v178_v60 }
  0xbc   :  { %v138_v21 = vmul.f32 %v134_v10, %v308_v30  ;;  %v139_v7 = vmul.f32 %v135_v11, %v308_v30 }
  0xbe   :  { %v141_v8 = vpack.c.bf16 %v139_v7, %v138_v21 }
  0xc0   :  { %143 = vst [vmem:[#allocation5 + $0x8] sm:$0xff] %v141_v8 }
  0xc1   :  { %156 = dma.vmem_to_hbm [thread:$0]  %s149_s13, 256, %s151_s16, [#allocation4], %s281_s17, %s281_s17, %s282_s18  }
  0xc2   :  { %274 = dma.done.wait [#allocation4], 256  }
  0xc3   :  { %275 = vsyncadd [#allocation4], 4294967040 }
  0xc4   :  { %161 = vsyncpa [#allocation3], 1 }
  0xc5   :  { %162 = vsyncpa [#allocation4], 1 }

</bundles_post_ra>
